<compile_context>
chip_gen: v7x
topology: tpu7x:2x2x1
jax: 0.10.0
libtpu: 0.0.40
codegen_flags: <defaults>
</compile_context>

<pallas_src>
import functools

import numpy as np
import jax
import jax.numpy as jnp
from jax.experimental import pallas as pl
from jax.experimental.pallas import tpu as pltpu

# ----- db4 (Daubechies-4, 8 taps) decomposition filters, pywt convention ----
_DB4_REC_LO = np.array(
    [0.23037781330885523, 0.7148465705525415, 0.6308807679295904,
     -0.02798376941698385, -0.18703481171888114, 0.030841381835986965,
     0.032883011666982945, -0.010597401784997278], dtype=np.float64)
# dec_hi[k] = (-1)^(k+1) * rec_lo[k]   (pywt QMF convention)
_DB4_DEC_HI = _DB4_REC_LO * np.array([-1.0, 1.0] * 4)
_FLT = 8
# Reversed high-pass filter used in the strided-correlation form of the DWT:
#   cD1[k] = sum_j dec_hi[F-1-j] * x_ext[2k + 1 + j]
#          = sum_m fr[2m]*x_odd[k+m] + fr[2m+1]*x_even[k+m],  m = 0..3
_FR = tuple(float(v) for v in _DB4_DEC_HI[::-1])


def _round_up(x, m):
    return (x + m - 1) // m * m


def _prv_kernel(x_ref, out_ref, *, out_len, half):
    """Level-1 db4 detail coefficients -> per-row (max - min).

    x_ref: (TB, 2*half); lanes [0, half) = odd phase x_ext[1::2],
                         lanes [half, 2*half) = even phase x_ext[2::2].
    """
    K = out_len
    H = half
    # 8 ref-sliced shifted loads (the shift rides on the load path, so no
    # standalone XLU shifts and no z-intermediates that Mosaic would have to
    # materialize/spill).  Two independent accumulation chains for ILP.
    a0 = (_FR[0] * x_ref[:, 0:K] + _FR[1] * x_ref[:, H:H + K]
          + _FR[4] * x_ref[:, 2:2 + K] + _FR[5] * x_ref[:, H + 2:H + 2 + K])
    a1 = (_FR[2] * x_ref[:, 1:1 + K] + _FR[3] * x_ref[:, H + 1:H + 1 + K]
          + _FR[6] * x_ref[:, 3:3 + K] + _FR[7] * x_ref[:, H + 3:H + 3 + K])
    c = a0 + a1                                    # (TB, K) = cD1 per row

    # Row-wise max/min: fold full 128-lane chunks elementwise (pure VALU),
    # then at most two cross-lane reduces per row, so XLU cost stays O(1)
    # per row even for long rPPG windows.
    C = 128
    nfull = K // C
    if nfull >= 2:
        amax = c[:, :C]
        amin = c[:, :C]
        for ci in range(1, nfull):
            blk = c[:, ci * C:(ci + 1) * C]
            amax = jnp.maximum(amax, blk)
            amin = jnp.minimum(amin, blk)
        mx = jnp.max(amax, axis=-1, keepdims=True)
        mn = jnp.min(amin, axis=-1, keepdims=True)
        if K % C:
            tail = c[:, nfull * C:]
            mx = jnp.maximum(mx, jnp.max(tail, axis=-1, keepdims=True))
            mn = jnp.minimum(mn, jnp.min(tail, axis=-1, keepdims=True))
    else:
        mx = jnp.max(c, axis=-1, keepdims=True)
        mn = jnp.min(c, axis=-1, keepdims=True)
    out_ref[...] = mx - mn


def _pack_phases(rppg, out_len, half):
    """One packed (B, 2*half) array: [odd phase | even phase] of the pywt
    'symmetric' level-1 extension, built directly from rPPG slices for BOTH
    parities of L (no extended-signal intermediate) and lane-padded in the
    same expression so XLA emits a single fusion / HBM write."""
    B, L = rppg.shape
    need = out_len + 3                       # kernel reads indices 0..out_len+2
    head_o = rppg[:, 1:6:2][:, ::-1]         # x5 x3 x1
    head_e = rppg[:, 0:5:2][:, ::-1]         # x4 x2 x0
    mid_o = rppg[:, 0::2]
    mid_e = rppg[:, 1::2]
    if L % 2 == 0:
        tail_o = rppg[:, L - 7::2][:, ::-1]  # x_{L-1} x_{L-3} x_{L-5} x_{L-7}
        tail_e = rppg[:, L - 6::2][:, ::-1]  # x_{L-2} x_{L-4} x_{L-6}
    else:
        tail_o = rppg[:, L - 6::2][:, ::-1]  # x_{L-2} x_{L-4} x_{L-6}
        tail_e = rppg[:, L - 7::2][:, ::-1]  # x_{L-1} x_{L-3} x_{L-5} x_{L-7}
    xo = jnp.concatenate([head_o, mid_o, tail_o], axis=1)[:, :need]
    xe = jnp.concatenate([head_e, mid_e, tail_e], axis=1)[:, :need]
    pad = half - need
    pieces = [xo]
    if pad:
        pieces.append(jnp.zeros((B, pad), rppg.dtype))
    pieces.append(xe)
    if pad:
        pieces.append(jnp.zeros((B, pad), rppg.dtype))
    return jnp.concatenate(pieces, axis=1)


def wavelet_prv(rppg, wavelet_weights, wavelet_bias, *, levels=4):
    """Pallas implementation of WaveletPRVModule.forward."""
    del wavelet_bias  # bias cancels in max(c) - min(c) (affine identity)
    rppg = rppg.astype(jnp.float32)
    B, L = rppg.shape
    F = _FLT
    assert L >= F, "signal shorter than the db4 filter is not supported"
    out_len = (L + F - 1) // 2               # len(cD1), pywt rule
    half = _round_up(out_len + 3, 128)       # per-phase lane width
    W2 = 2 * half                            # packed block lane width

    # Single fused pre-pass -> one kernel input -> one DMA per grid step.
    packed = _pack_phases(rppg, out_len, half)

    # Batch tile from explicit VMEM accounting (per grid step):
    #   input : 2 pipeline buffers * TB * W2 * 4 B
    #   temps : ~6 live (TB, ~Kr) f32 values materialized by Mosaic
    Kr = _round_up(out_len, 128)
    bytes_per_row = 4 * (2 * W2 + 6 * Kr)
    budget_bytes = 16 * 1024 * 1024          # >2x headroom under the 32 MiB
                                             # scoped limit (v7x: 64 MiB phys)
    tb_cap = max(8, (budget_bytes // bytes_per_row) // 8 * 8)
    tb_cap = min(tb_cap, 2048)
    B8 = _round_up(B, 8)
    if B8 >= 16:
        # >=2 balanced grid steps so both v7x TensorCores get work.
        tb_cap = min(tb_cap, _round_up((B8 + 1) // 2, 8))
    TB = int(min(tb_cap, B8))
    B_pad = _round_up(B, TB)
    if B_pad != B:
        packed = jnp.pad(packed, ((0, B_pad - B), (0, 0)))

    out = pl.pallas_call(
        functools.partial(_prv_kernel, out_len=out_len, half=half),
        out_shape=jax.ShapeDtypeStruct((B_pad, 1), jnp.float32),
        grid=(B_pad // TB,),
        in_specs=[pl.BlockSpec((TB, W2), lambda i: (i, 0))],
        out_specs=pl.BlockSpec((TB, 1), lambda i: (i, 0)),
        compiler_params=pltpu.CompilerParams(
            dimension_semantics=("parallel",),
            vmem_limit_bytes=32 * 1024 * 1024),
    )(packed)

    # Affine identity: max(a*w+b) - min(a*w+b) == |w| * (max(a) - min(a)).
    # TODO(synk): the reference module indexes wavelet_weights[len(coeffs)-1]
    # == wavelet_weights[levels] for coeff[-1], which is out of bounds for a
    # (levels, 1) parameter; we clamp to the last valid index (levels - 1).
    w = jnp.abs(wavelet_weights[levels - 1, 0].astype(jnp.float32))
    return out[:B, 0] * w


def _reference(rppg, weights, bias, levels=4):
    """Pure-numpy reference (same DWT math, float64, full affine applied)."""
    x = np.asarray(rppg, dtype=np.float64)
    B, L = x.shape
    F = _FLT
    out_len = (L + F - 1) // 2
    res = np.zeros((B,), dtype=np.float64)
    for i in range(B):
        s = x[i]
        ext = np.concatenate([s[:F - 1][::-1], s, s[-(F - 1):][::-1]])
        cd1 = np.zeros(out_len)
        for k in range(out_len):
            for j in range(F):
                cd1[k] += _DB4_DEC_HI[F - 1 - j] * ext[2 * k + 1 + j]
        c = cd1 * float(weights[levels - 1, 0]) + float(bias[levels - 1, 0])
        res[i] = c.max() - c.min()
    return res.astype(np.float32)


if __name__ == "__main__":
    key = jax.random.PRNGKey(0)
    k1, k2, k3, k4 = jax.random.split(key, 4)
    LEVELS = 4
    wavelet_weights = jax.random.normal(k2, (LEVELS, 1), dtype=jnp.float32)
    wavelet_bias = jax.random.normal(k3, (LEVELS, 1), dtype=jnp.float32)

    run = jax.jit(lambda r, w, b: wavelet_prv(r, w, b, levels=LEVELS))

    # Main case: even L.
    B, L = 4, 128
    rppg = jax.random.normal(k1, (B, L), dtype=jnp.float32)
    prv = jax.block_until_ready(run(rppg, wavelet_weights, wavelet_bias))
    assert prv.shape == (B,)
    ref = _reference(np.asarray(rppg), np.asarray(wavelet_weights),
                     np.asarray(wavelet_bias), levels=LEVELS)
    np.testing.assert_allclose(np.asarray(prv), ref, rtol=1e-4, atol=1e-4)

    # Secondary case: odd L + batch padding (direct phase construction too).
    B2, L2 = 5, 97
    rppg2 = jax.random.normal(k4, (B2, L2), dtype=jnp.float32)
    prv2 = jax.block_until_ready(
        wavelet_prv(rppg2, wavelet_weights, wavelet_bias, levels=LEVELS))
    ref2 = _reference(np.asarray(rppg2), np.asarray(wavelet_weights),
                      np.asarray(wavelet_bias), levels=LEVELS)
    np.testing.assert_allclose(np.asarray(prv2), ref2, rtol=1e-4, atol=1e-4)

    print("KERNEL_OK")
</pallas_src>

<mosaic_0001>
module attributes {stable_mosaic.version = 11 : i64} {
  func.func @_prv_kernel(%arg0: i32, %arg1: memref<8x256xf32, #tpu.memory_space<vmem>>, %arg2: memref<8x1xf32, #tpu.memory_space<vmem>>) attributes {dimension_semantics = [#tpu.dimension_semantics<parallel>], iteration_bounds = array<i64: 1>, scalar_prefetch = 0 : i64, scratch_operands = 0 : i64, tpu.core_type = #tpu.core_type<tc>, window_params = [{transform_indices = @transform_0, window_bounds = array<i64: 8, 256>}, {transform_indices = @transform_1, window_bounds = array<i64: 8, 1>}]} {
    %c0 = arith.constant 0 : index
    %c0_0 = arith.constant 0 : index
    %0 = vector.load %arg1[%c0, %c0_0] : memref<8x256xf32, #tpu.memory_space<vmem>>, vector<8x67xf32>
    %cst = arith.constant -0.0105974022 : f32
    %1 = vector.broadcast %cst : f32 to vector<8x67xf32>
    %2 = arith.mulf %1, %0 : vector<8x67xf32>
    %c0_1 = arith.constant 0 : index
    %c128 = arith.constant 128 : index
    %3 = vector.load %arg1[%c0_1, %c128] : memref<8x256xf32, #tpu.memory_space<vmem>>, vector<8x67xf32>
    %cst_2 = arith.constant -0.0328830108 : f32
    %4 = vector.broadcast %cst_2 : f32 to vector<8x67xf32>
    %5 = arith.mulf %4, %3 : vector<8x67xf32>
    %6 = arith.addf %2, %5 : vector<8x67xf32>
    %c0_3 = arith.constant 0 : index
    %c2 = arith.constant 2 : index
    %7 = vector.load %arg1[%c0_3, %c2] : memref<8x256xf32, #tpu.memory_space<vmem>>, vector<8x67xf32>
    %cst_4 = arith.constant -0.0279837698 : f32
    %8 = vector.broadcast %cst_4 : f32 to vector<8x67xf32>
    %9 = arith.mulf %8, %7 : vector<8x67xf32>
    %10 = arith.addf %6, %9 : vector<8x67xf32>
    %c0_5 = arith.constant 0 : index
    %c130 = arith.constant 130 : index
    %11 = vector.load %arg1[%c0_5, %c130] : memref<8x256xf32, #tpu.memory_space<vmem>>, vector<8x67xf32>
    %cst_6 = arith.constant -0.630880773 : f32
    %12 = vector.broadcast %cst_6 : f32 to vector<8x67xf32>
    %13 = arith.mulf %12, %11 : vector<8x67xf32>
    %14 = arith.addf %10, %13 : vector<8x67xf32>
    %c0_7 = arith.constant 0 : index
    %c1 = arith.constant 1 : index
    %15 = vector.load %arg1[%c0_7, %c1] : memref<8x256xf32, #tpu.memory_space<vmem>>, vector<8x67xf32>
    %cst_8 = arith.constant 0.0308413822 : f32
    %16 = vector.broadcast %cst_8 : f32 to vector<8x67xf32>
    %17 = arith.mulf %16, %15 : vector<8x67xf32>
    %c0_9 = arith.constant 0 : index
    %c129 = arith.constant 129 : index
    %18 = vector.load %arg1[%c0_9, %c129] : memref<8x256xf32, #tpu.memory_space<vmem>>, vector<8x67xf32>
    %cst_10 = arith.constant 0.187034816 : f32
    %19 = vector.broadcast %cst_10 : f32 to vector<8x67xf32>
    %20 = arith.mulf %19, %18 : vector<8x67xf32>
    %21 = arith.addf %17, %20 : vector<8x67xf32>
    %c0_11 = arith.constant 0 : index
    %c3 = arith.constant 3 : index
    %22 = vector.load %arg1[%c0_11, %c3] : memref<8x256xf32, #tpu.memory_space<vmem>>, vector<8x67xf32>
    %cst_12 = arith.constant 0.714846551 : f32
    %23 = vector.broadcast %cst_12 : f32 to vector<8x67xf32>
    %24 = arith.mulf %23, %22 : vector<8x67xf32>
    %25 = arith.addf %21, %24 : vector<8x67xf32>
    %c0_13 = arith.constant 0 : index
    %c131 = arith.constant 131 : index
    %26 = vector.load %arg1[%c0_13, %c131] : memref<8x256xf32, #tpu.memory_space<vmem>>, vector<8x67xf32>
    %cst_14 = arith.constant -0.230377808 : f32
    %27 = vector.broadcast %cst_14 : f32 to vector<8x67xf32>
    %28 = arith.mulf %27, %26 : vector<8x67xf32>
    %29 = arith.addf %25, %28 : vector<8x67xf32>
    %30 = arith.addf %14, %29 : vector<8x67xf32>
    %cst_15 = arith.constant dense<0xFF800000> : vector<8xf32>
    %31 = vector.multi_reduction <maximumf>, %30, %cst_15 [1] : vector<8x67xf32> to vector<8xf32>
    %32 = vector.shape_cast %31 : vector<8xf32> to vector<8x1xf32>
    %cst_16 = arith.constant dense<0x7F800000> : vector<8xf32>
    %33 = vector.multi_reduction <minimumf>, %30, %cst_16 [1] : vector<8x67xf32> to vector<8xf32>
    %34 = vector.shape_cast %33 : vector<8xf32> to vector<8x1xf32>
    %35 = arith.subf %32, %34 : vector<8x1xf32>
    %c0_17 = arith.constant 0 : index
    %c0_18 = arith.constant 0 : index
    %36 = vector.load %arg2[%c0_17, %c0_18] : memref<8x1xf32, #tpu.memory_space<vmem>>, vector<8x1xf32>
    tpu.vector_store %arg2[%c0_17, %c0_18], %35 {strides = array<i32>} : memref<8x1xf32, #tpu.memory_space<vmem>>, vector<8x1xf32>,
    return
  }
  func.func @transform_0(%arg0: i32) -> (i32, i32) {
    %c0_i32 = arith.constant 0 : i32
    %c0_i32_0 = arith.constant 0 : i32
    return %arg0, %c0_i32 : i32, i32
  }
  func.func @transform_1(%arg0: i32) -> (i32, i32) {
    %c0_i32 = arith.constant 0 : i32
    %c0_i32_0 = arith.constant 0 : i32
    return %arg0, %c0_i32 : i32, i32
  }
}

</mosaic_0001>

<bundles_post_ra>
// kernel: _lambda_.1
= control target key start
LH: loop header
LB: loop body
LE: loop exit
PB: predicated region body
PF: predicated region fallthrough
CT: control target
= control target key end

     0   :  { %s61_s10 = smov 126   ;;  %vm45_vm0 = vcmask 547840   ;;  %vm53_vm1 = vcmask 7168   ;;  %s82_s0 = inlined_call_operand.vmem [shape: f32[8,256], index: 0, kind: input, shape index: {}]   ;;  %s83_s1 = inlined_call_operand.vmem [shape: f32[8,1], index: 1, kind: output, shape index: {}]  }
   0x1   :  { %v8_v0 = vld [vmem:[%s82_s0] sm:$0xff]  ;;  %v10_v1 = vld [vmem:[%s82_s0 + $0x8] sm:$0xff]  ;;  %s62_s0 = smov 127  }
   0x2   :  { %v28_v2 = vmul.f32 0.71484655, %v8_v0  ;;  %v13_v3 = vmul.f32 -0.02798377, %v8_v0  ;;  %v34_v4 = vmul.f32 -0.23037781, %v10_v1 }
   0x3   :  { %v26_v5 = vmul.f32 0.18703482, %v10_v1  ;;  %v25_v6 = vmul.f32 0.030841382, %v8_v0  ;;  %v19_v7 = vmul.f32 -0.6308808, %v10_v1 }
   0x4   :  { %30 = vrot.lane.b32.xlu0 %v28_v2, %s61_s10  ;;  %15 = vrot.lane.b32.xlu1 %v13_v3, %s61_s10  ;;  %v11_v8 = vmul.f32 -0.03288301, %v10_v1  ;;  %v9_v9 = vmul.f32 -0.010597402, %v8_v0 }
   0x5   :  { %v27_v10 = vadd.f32 %v26_v5, %v25_v6 }
   0x6   :  { %v12_v11 = vadd.f32 %v11_v8, %v9_v9 }
   0x8   :  { %36 = vrot.lane.b32.xlu0 %v34_v4, %s61_s10  ;;  %21 = vrot.lane.b32.xlu1 %v19_v7, %s61_s10 }
  0x76   :  { %v31_v12 = vpop.permute.xlu0 %30  ;;  %v16_v16 = vpop.permute.xlu1 %15 }
  0x77   :  { %v33_v13 = vadd.f32 %v31_v12, %v27_v10  ;;  %v18_v17 = vadd.f32 %v16_v16, %v12_v11 }
  0x7a   :  { %v37_v14 = vpop.permute.xlu0 %36  ;;  %v22_v18 = vpop.permute.xlu1 %21 }
  0x7b   :  { %v39_v15 = vadd.f32 %v37_v14, %v33_v13  ;;  %v24_v19 = vadd.f32 %v22_v18, %v18_v17 }
  0x7d   :  { %41 = vrot.lane.b32.xlu0 %v39_v15, %s62_s0 }
  0xef   :  { %v42_v20 = vpop.permute.xlu0 %41 }
  0xf0   :  { %v44_v21 = vadd.f32 %v42_v20, %v24_v19 }
  0xf2   :  { %v49_v22 = vsel %vm45_vm0, %v44_v21, inf  ;;  %v46_v23 = vsel %vm45_vm0, %v44_v21, -inf }
  0xf3   :  { %50 = vmin.xlane.f32.xlu0 %v49_v22  ;;  %47 = vmax.xlane.f32.xlu1 %v46_v23 }
 0x180   :  { %v51_v24 = vpop.xlane.xlu0 %50  ;;  %v48_v25 = vpop.xlane.xlu1 %47 }
 0x181   :  { %v52_v26 = vsub.f32 %v48_v25, %v51_v24 }
 0x183   :  { %54 = vst.msk [vmem:[%s83_s1] sm:$0xff] %vm53_vm1, %v52_v26 }

</bundles_post_ra>
